<compile_context>
chip_gen: v7x
topology: tpu7x:2x2x1
jax: 0.10.0
libtpu: 0.0.40
codegen_flags: <defaults>
</compile_context>

<pallas_src>
import functools
from typing import NamedTuple, Tuple, Any

import jax
import jax.numpy as jnp
from jax.experimental import pallas as pl
from jax.experimental.pallas import tpu as pltpu


def _round_up(x, m):
    return (x + m - 1) // m * m


# ----------------------------------------------------------------------------
# Kernel
# ----------------------------------------------------------------------------
def _downsampler_kernel(*refs, num_layers, compute_dtype):
    """refs = (x, w0, b0, w1, b1, ..., w_{L-1}, b_{L-1}, out, acc_scratch).

    Grid = (batch_tiles, k_tiles).  Layer 0 accumulates K tiles into the f32
    VMEM scratch; on the last K step the remaining layers run entirely
    on-chip and the result is stored.
    """
    x_ref = refs[0]
    o_ref = refs[1 + 2 * num_layers]
    acc_ref = refs[2 + 2 * num_layers]
    w_refs = [refs[1 + 2 * l] for l in range(num_layers)]
    b_refs = [refs[2 + 2 * l] for l in range(num_layers)]

    k = pl.program_id(1)

    @pl.when(k == 0)
    def _():
        acc_ref[...] = jnp.zeros_like(acc_ref)

    # Layer 0: bf16 x bf16 -> f32 MXU matmul, K-tiled accumulation.
    acc_ref[...] += jnp.dot(x_ref[...], w_refs[0][...],
                            preferred_element_type=jnp.float32)

    @pl.when(k == pl.num_programs(1) - 1)
    def _():
        act = acc_ref[...] + b_refs[0][...].astype(jnp.float32)
        if num_layers > 1:
            act = jnp.maximum(act, 0.0)          # ReLU (hidden layers only)
        for l in range(1, num_layers):           # static unroll over layers
            y = jnp.dot(act.astype(compute_dtype), w_refs[l][...],
                        preferred_element_type=jnp.float32)
            y = y + b_refs[l][...].astype(jnp.float32)
            if l < num_layers - 1:
                y = jnp.maximum(y, 0.0)
            act = y
        o_ref[...] = act.astype(o_ref.dtype)


# ----------------------------------------------------------------------------
# Parameter preparation (pad + cast ONCE, outside the forward)
# ----------------------------------------------------------------------------
class PreparedDownsampler(NamedTuple):
    w_pads: Tuple[jax.Array, ...]   # bf16, zero-padded, lane-dense
    b_pads: Tuple[jax.Array, ...]   # f32, zero-padded (added on f32 acc)
    in_features: int
    out_features: int
    k_tile: int                     # TK for layer-0 K streaming
    k_pad: int                      # padded layer-0 input dim (multiple of TK)
    dout_pads: Tuple[int, ...]
    compute_dtype: Any


def prepare_downsampler_params(params, *, compute_dtype=jnp.bfloat16, k_tile=512):
    """params: list of (w, b), w: [d_in, d_out], b: [1, d_out] (full precision)."""
    dims = [(int(w.shape[0]), int(w.shape[1])) for (w, _) in params]
    for li in range(1, len(dims)):
        assert dims[li][0] == dims[li - 1][1], "layer dims must chain"
    in_features = dims[0][0]
    out_features = dims[-1][1]

    tk = min(_round_up(k_tile, 128), _round_up(in_features, 128))
    k_pad = _round_up(in_features, tk)
    dout_pads = tuple(_round_up(d_out, 128) for (_, d_out) in dims)

    w_pads, b_pads = [], []
    for li, ((w, b), d_out_pad) in enumerate(zip(params, dout_pads)):
        d_in_pad = k_pad if li == 0 else dout_pads[li - 1]
        wp = jnp.zeros((d_in_pad, d_out_pad), compute_dtype)
        wp = wp.at[:w.shape[0], :w.shape[1]].set(w.astype(compute_dtype))
        bp = jnp.zeros((1, d_out_pad), jnp.float32)
        bp = bp.at[:, :b.shape[1]].set(b.reshape(1, -1).astype(jnp.float32))
        w_pads.append(wp)
        b_pads.append(bp)

    return PreparedDownsampler(
        w_pads=tuple(w_pads), b_pads=tuple(b_pads),
        in_features=in_features, out_features=out_features,
        k_tile=tk, k_pad=k_pad, dout_pads=dout_pads,
        compute_dtype=jnp.dtype(compute_dtype))


# ----------------------------------------------------------------------------
# Forward
# ----------------------------------------------------------------------------
def downsampler_forward(x, prep: PreparedDownsampler, *, batch_tile=256):
    """x: [B, in_features].  Returns [B, out_features] in x.dtype."""
    B, Din = x.shape
    assert Din == prep.in_features
    out_dtype = x.dtype
    cdt = prep.compute_dtype
    num_layers = len(prep.w_pads)
    TK, Kp = prep.k_tile, prep.k_pad
    dout_pads = prep.dout_pads
    Dout_pad = dout_pads[-1]

    # ---- batch tiling ------------------------------------------------------
    # bf16 packs 16 rows per sublane group; f32 needs multiples of 8.
    row_align = 16 if jnp.dtype(cdt).itemsize == 2 else 8
    B_al = _round_up(B, row_align)
    TB = min(_round_up(batch_tile, row_align), B_al)
    # Guarantee >=2 batch tiles when possible so both v7x TensorCores get work.
    while pl.cdiv(B_al, TB) < 2 and TB > row_align:
        TB = _round_up(TB // 2, row_align)
    Bp = _round_up(B_al, TB)
    grid_b = Bp // TB
    grid_k = Kp // TK

    # ---- pad activation (only per-call padding that remains) ----------------
    x_pad = jnp.pad(x.astype(cdt), ((0, Bp - B), (0, Kp - Din)))

    # ---- VMEM budget (generation-aware cap) ----------------------------------
    cbytes = jnp.dtype(cdt).itemsize
    obytes = jnp.dtype(out_dtype).itemsize

    def _vmem_estimate(w_bufs):
        resident = (sum(int(w.size) * cbytes for w in prep.w_pads[1:])
                    + sum(int(b.size) * 4 for b in prep.b_pads)) * w_bufs
        streamed = 2 * (TB * TK * cbytes          # x tile (double-buffered)
                        + TK * dout_pads[0] * cbytes  # layer-0 weight tile
                        + TB * Dout_pad * obytes)     # output tile
        acc_bytes = TB * dout_pads[0] * 4             # f32 accumulator scratch
        act_bytes = 2 * TB * max(dout_pads) * 4       # two live f32 activations
        return int(1.25 * (resident + streamed + acc_bytes + act_bytes)) + (4 << 20)

    try:
        vmem_cap = int(pltpu.get_tpu_info().vmem_capacity_bytes)
    except Exception:
        vmem_cap = 64 << 20                           # conservative (v7x per-TC)
    cap_safe = max(vmem_cap - (8 << 20), 16 << 20)

    # ---- cost estimate -------------------------------------------------------
    flops = 2 * Bp * Kp * dout_pads[0] + sum(
        2 * Bp * dout_pads[l - 1] * dout_pads[l] for l in range(1, num_layers))
    param_bytes = sum(int(a.size) * a.dtype.itemsize
                      for a in (*prep.w_pads, *prep.b_pads))
    bytes_accessed = int(x_pad.size * cbytes + Bp * Dout_pad * obytes + param_bytes)
    cost = pl.CostEstimate(flops=int(flops), transcendentals=0,
                           bytes_accessed=bytes_accessed)

    kernel = functools.partial(_downsampler_kernel,
                               num_layers=num_layers, compute_dtype=cdt)

    def _run(single_buffer_weights):
        def resident_spec(shape):
            if single_buffer_weights:
                # Constant block index -> a second pipeline buffer is pure waste.
                return pl.BlockSpec(shape, lambda i, k: (0, 0),
                                    pipeline_mode=pl.Buffered(buffer_count=1))
            return pl.BlockSpec(shape, lambda i, k: (0, 0))

        in_specs = [pl.BlockSpec((TB, TK), lambda i, k: (i, k))]       # x tile
        flat_inputs = [x_pad]
        # Layer-0 weight: streamed over K (default double-buffer -> DMA overlap).
        in_specs.append(pl.BlockSpec((TK, dout_pads[0]), lambda i, k: (k, 0)))
        flat_inputs.append(prep.w_pads[0])
        in_specs.append(resident_spec(prep.b_pads[0].shape))
        flat_inputs.append(prep.b_pads[0])
        for l in range(1, num_layers):
            in_specs.append(resident_spec(prep.w_pads[l].shape))
            flat_inputs.append(prep.w_pads[l])
            in_specs.append(resident_spec(prep.b_pads[l].shape))
            flat_inputs.append(prep.b_pads[l])

        w_bufs = 1 if single_buffer_weights else 2
        vmem_limit = min(max(32 << 20, _vmem_estimate(w_bufs)), cap_safe)

        return pl.pallas_call(
            kernel,
            out_shape=jax.ShapeDtypeStruct((Bp, Dout_pad), out_dtype),
            grid=(grid_b, grid_k),
            in_specs=in_specs,
            out_specs=pl.BlockSpec((TB, Dout_pad), lambda i, k: (i, 0)),
            scratch_shapes=[pltpu.VMEM((TB, dout_pads[0]), jnp.float32)],
            compiler_params=pltpu.CompilerParams(
                dimension_semantics=("parallel", "arbitrary"),
                vmem_limit_bytes=vmem_limit),
            cost_estimate=cost,
        )(*flat_inputs)

    try:
        out_pad = _run(hasattr(pl, "Buffered"))
    except Exception:
        # Fallback for JAX versions where single-buffered BlockSpecs are rejected.
        out_pad = _run(False)

    return out_pad[:B, :prep.out_features]


# ----------------------------------------------------------------------------
# Parameter init (matches the PyTorch module's shapes / default init)
# ----------------------------------------------------------------------------
def init_downsampler_params(key, num_layers, in_features, out_features,
                            dtype=jnp.float32):
    dims = []
    for i in range(num_layers - 1):
        dims.append((in_features // 2 ** i, in_features // 2 ** (i + 1)))
    dims.append((in_features // 2 ** (num_layers - 1), out_features))

    params = []
    for (d_in, d_out) in dims:
        key, kw, kb = jax.random.split(key, 3)
        bound = 1.0 / (d_in ** 0.5)   # PyTorch nn.Linear default init
        w = jax.random.uniform(kw, (d_in, d_out), dtype, -bound, bound)
        b = jax.random.uniform(kb, (1, d_out), dtype, -bound, bound)
        params.append((w, b))
    return params


if __name__ == "__main__":
    num_layers = 3
    dropout_rate = 0.1      # identity in eval-mode forward
    in_features = 32
    out_features = 8
    batch = 4

    key = jax.random.PRNGKey(0)
    key, kx = jax.random.split(key)
    x = jax.random.normal(kx, (batch, in_features), jnp.float32)

    params = init_downsampler_params(key, num_layers, in_features, out_features)
    prep = prepare_downsampler_params(params)      # pad + cast once

    out = downsampler_forward(x, prep)
    out = jax.block_until_ready(out)
    assert out.shape == (batch, out_features), out.shape

    # Reference 1: same math with emulated bf16 matmul inputs / f32 accumulation.
    ref_bf = x.astype(jnp.float32)
    for i, (w, b) in enumerate(params):
        y = jnp.dot(ref_bf.astype(jnp.bfloat16), w.astype(jnp.bfloat16),
                    preferred_element_type=jnp.float32) + b
        if i < len(params) - 1:
            y = jnp.maximum(y, 0.0)
        ref_bf = y
    assert jnp.allclose(out, ref_bf, atol=1e-2, rtol=1e-2), \
        float(jnp.max(jnp.abs(out - ref_bf)))

    # Reference 2: full-precision module math (looser tol due to bf16 MXU feed).
    ref32 = x
    for i, (w, b) in enumerate(params):
        ref32 = ref32 @ w + b
        if i < len(params) - 1:
            ref32 = jnp.maximum(ref32, 0.0)
    assert jnp.allclose(out, ref32, atol=5e-2, rtol=5e-2), \
        float(jnp.max(jnp.abs(out - ref32)))

    print("KERNEL_OK")
</pallas_src>

<mosaic_0001>
module attributes {stable_mosaic.version = 11 : i64} {
  func.func @_downsampler_kernel(%arg0: i32, %arg1: i32, %arg2: memref<16x128xbf16, #tpu.memory_space<vmem>>, %arg3: memref<128x128xbf16, #tpu.memory_space<vmem>>, %arg4: memref<1x128xf32, #tpu.memory_space<vmem>>, %arg5: memref<128x128xbf16, #tpu.memory_space<vmem>>, %arg6: memref<1x128xf32, #tpu.memory_space<vmem>>, %arg7: memref<128x128xbf16, #tpu.memory_space<vmem>>, %arg8: memref<1x128xf32, #tpu.memory_space<vmem>>, %arg9: memref<16x128xf32, #tpu.memory_space<vmem>>, %arg10: memref<16x128xf32, #tpu.memory_space<vmem>>) attributes {dimension_semantics = [#tpu.dimension_semantics<parallel>, #tpu.dimension_semantics<arbitrary>], iteration_bounds = array<i64: 1, 1>, scalar_prefetch = 0 : i64, scratch_operands = 1 : i64, tpu.core_type = #tpu.core_type<tc>, window_params = [{transform_indices = @transform_0, window_bounds = array<i64: 16, 128>}, {transform_indices = @transform_1, window_bounds = array<i64: 128, 128>}, {pipeline_mode = #tpu.pipeline_mode<synchronous>, transform_indices = @transform_2, window_bounds = array<i64: 1, 128>}, {pipeline_mode = #tpu.pipeline_mode<synchronous>, transform_indices = @transform_3, window_bounds = array<i64: 128, 128>}, {pipeline_mode = #tpu.pipeline_mode<synchronous>, transform_indices = @transform_4, window_bounds = array<i64: 1, 128>}, {pipeline_mode = #tpu.pipeline_mode<synchronous>, transform_indices = @transform_5, window_bounds = array<i64: 128, 128>}, {pipeline_mode = #tpu.pipeline_mode<synchronous>, transform_indices = @transform_6, window_bounds = array<i64: 1, 128>}, {transform_indices = @transform_7, window_bounds = array<i64: 16, 128>}]} {
    %c0_i32 = arith.constant 0 : i32
    %0 = arith.cmpi eq, %arg1, %c0_i32 : i32
    %1 = arith.extui %0 : i1 to i32
    %c0_i32_0 = arith.constant 0 : i32
    %2 = arith.cmpi ne, %1, %c0_i32_0 : i32
    scf.if %2 {
      %cst_10 = arith.constant 0.000000e+00 : f32
      %12 = vector.broadcast %cst_10 : f32 to vector<16x128xf32>
      %c0_11 = arith.constant 0 : index
      %c0_12 = arith.constant 0 : index
      %13 = vector.load %arg10[%c0_11, %c0_12] : memref<16x128xf32, #tpu.memory_space<vmem>>, vector<16x128xf32>
      tpu.vector_store %arg10[%c0_11, %c0_12], %12 {strides = array<i32>} : memref<16x128xf32, #tpu.memory_space<vmem>>, vector<16x128xf32>,
    } else {
    }
    %c0 = arith.constant 0 : index
    %c0_1 = arith.constant 0 : index
    %3 = vector.load %arg10[%c0, %c0_1] : memref<16x128xf32, #tpu.memory_space<vmem>>, vector<16x128xf32>
    %c0_2 = arith.constant 0 : index
    %c0_3 = arith.constant 0 : index
    %4 = vector.load %arg2[%c0_2, %c0_3] : memref<16x128xbf16, #tpu.memory_space<vmem>>, vector<16x128xbf16>
    %c0_4 = arith.constant 0 : index
    %c0_5 = arith.constant 0 : index
    %5 = vector.load %arg3[%c0_4, %c0_5] : memref<128x128xbf16, #tpu.memory_space<vmem>>, vector<128x128xbf16>
    %cst = arith.constant dense<0.000000e+00> : vector<16x128xf32>
    %6 = tpu.matmul %4, %5, %cst {dimension_numbers = #tpu.dot_dimension_numbers<[1], [0], [0], [1], [0, 0, 1, 1], [], []>} : vector<16x128xbf16>, vector<128x128xbf16>, vector<16x128xf32> -> vector<16x128xf32>
    %7 = arith.addf %3, %6 : vector<16x128xf32>
    %c0_6 = arith.constant 0 : index
    %c0_7 = arith.constant 0 : index
    %8 = vector.load %arg10[%c0_6, %c0_7] : memref<16x128xf32, #tpu.memory_space<vmem>>, vector<16x128xf32>
    tpu.vector_store %arg10[%c0_6, %c0_7], %7 {strides = array<i32>} : memref<16x128xf32, #tpu.memory_space<vmem>>, vector<16x128xf32>,
    %c0_i32_8 = arith.constant 0 : i32
    %9 = arith.cmpi eq, %arg1, %c0_i32_8 : i32
    %10 = arith.extui %9 : i1 to i32
    %c0_i32_9 = arith.constant 0 : i32
    %11 = arith.cmpi ne, %10, %c0_i32_9 : i32
    scf.if %11 {
      %c0_10 = arith.constant 0 : index
      %c0_11 = arith.constant 0 : index
      %12 = vector.load %arg10[%c0_10, %c0_11] : memref<16x128xf32, #tpu.memory_space<vmem>>, vector<16x128xf32>
      %c0_12 = arith.constant 0 : index
      %c0_13 = arith.constant 0 : index
      %13 = vector.load %arg4[%c0_12, %c0_13] : memref<1x128xf32, #tpu.memory_space<vmem>>, vector<1x128xf32>
      %14 = vector.broadcast %13 : vector<1x128xf32> to vector<16x128xf32>
      %15 = arith.addf %12, %14 : vector<16x128xf32>
      %cst_14 = arith.constant 0.000000e+00 : f32
      %16 = vector.broadcast %cst_14 : f32 to vector<16x128xf32>
      %17 = arith.maximumf %15, %16 : vector<16x128xf32>
      %18 = arith.truncf %17 : vector<16x128xf32> to vector<16x128xbf16>
      %c0_15 = arith.constant 0 : index
      %c0_16 = arith.constant 0 : index
      %19 = vector.load %arg5[%c0_15, %c0_16] : memref<128x128xbf16, #tpu.memory_space<vmem>>, vector<128x128xbf16>
      %cst_17 = arith.constant dense<0.000000e+00> : vector<16x128xf32>
      %20 = tpu.matmul %18, %19, %cst_17 {dimension_numbers = #tpu.dot_dimension_numbers<[1], [0], [0], [1], [0, 0, 1, 1], [], []>} : vector<16x128xbf16>, vector<128x128xbf16>, vector<16x128xf32> -> vector<16x128xf32>
      %c0_18 = arith.constant 0 : index
      %c0_19 = arith.constant 0 : index
      %21 = vector.load %arg6[%c0_18, %c0_19] : memref<1x128xf32, #tpu.memory_space<vmem>>, vector<1x128xf32>
      %22 = vector.broadcast %21 : vector<1x128xf32> to vector<16x128xf32>
      %23 = arith.addf %20, %22 : vector<16x128xf32>
      %cst_20 = arith.constant 0.000000e+00 : f32
      %24 = vector.broadcast %cst_20 : f32 to vector<16x128xf32>
      %25 = arith.maximumf %23, %24 : vector<16x128xf32>
      %26 = arith.truncf %25 : vector<16x128xf32> to vector<16x128xbf16>
      %c0_21 = arith.constant 0 : index
      %c0_22 = arith.constant 0 : index
      %27 = vector.load %arg7[%c0_21, %c0_22] : memref<128x128xbf16, #tpu.memory_space<vmem>>, vector<128x128xbf16>
      %cst_23 = arith.constant dense<0.000000e+00> : vector<16x128xf32>
      %28 = tpu.matmul %26, %27, %cst_23 {dimension_numbers = #tpu.dot_dimension_numbers<[1], [0], [0], [1], [0, 0, 1, 1], [], []>} : vector<16x128xbf16>, vector<128x128xbf16>, vector<16x128xf32> -> vector<16x128xf32>
      %c0_24 = arith.constant 0 : index
      %c0_25 = arith.constant 0 : index
      %29 = vector.load %arg8[%c0_24, %c0_25] : memref<1x128xf32, #tpu.memory_space<vmem>>, vector<1x128xf32>
      %30 = vector.broadcast %29 : vector<1x128xf32> to vector<16x128xf32>
      %31 = arith.addf %28, %30 : vector<16x128xf32>
      %c0_26 = arith.constant 0 : index
      %c0_27 = arith.constant 0 : index
      %32 = vector.load %arg9[%c0_26, %c0_27] : memref<16x128xf32, #tpu.memory_space<vmem>>, vector<16x128xf32>
      tpu.vector_store %arg9[%c0_26, %c0_27], %31 {strides = array<i32>} : memref<16x128xf32, #tpu.memory_space<vmem>>, vector<16x128xf32>,
    } else {
    }
    return
  }
  func.func @transform_0(%arg0: i32, %arg1: i32) -> (i32, i32) {
    %c0_i32 = arith.constant 0 : i32
    return %arg0, %arg1 : i32, i32
  }
  func.func @transform_1(%arg0: i32, %arg1: i32) -> (i32, i32) {
    %c0_i32 = arith.constant 0 : i32
    %c0_i32_0 = arith.constant 0 : i32
    return %arg1, %c0_i32 : i32, i32
  }
  func.func @transform_2(%arg0: i32, %arg1: i32) -> (i32, i32) {
    %c0_i32 = arith.constant 0 : i32
    %c0_i32_0 = arith.constant 0 : i32
    %c0_i32_1 = arith.constant 0 : i32
    return %c0_i32, %c0_i32_0 : i32, i32
  }
  func.func @transform_3(%arg0: i32, %arg1: i32) -> (i32, i32) {
    %c0_i32 = arith.constant 0 : i32
    %c0_i32_0 = arith.constant 0 : i32
    %c0_i32_1 = arith.constant 0 : i32
    return %c0_i32, %c0_i32_0 : i32, i32
  }
  func.func @transform_4(%arg0: i32, %arg1: i32) -> (i32, i32) {
    %c0_i32 = arith.constant 0 : i32
    %c0_i32_0 = arith.constant 0 : i32
    %c0_i32_1 = arith.constant 0 : i32
    return %c0_i32, %c0_i32_0 : i32, i32
  }
  func.func @transform_5(%arg0: i32, %arg1: i32) -> (i32, i32) {
    %c0_i32 = arith.constant 0 : i32
    %c0_i32_0 = arith.constant 0 : i32
    %c0_i32_1 = arith.constant 0 : i32
    return %c0_i32, %c0_i32_0 : i32, i32
  }
  func.func @transform_6(%arg0: i32, %arg1: i32) -> (i32, i32) {
    %c0_i32 = arith.constant 0 : i32
    %c0_i32_0 = arith.constant 0 : i32
    %c0_i32_1 = arith.constant 0 : i32
    return %c0_i32, %c0_i32_0 : i32, i32
  }
  func.func @transform_7(%arg0: i32, %arg1: i32) -> (i32, i32) {
    %c0_i32 = arith.constant 0 : i32
    %c0_i32_0 = arith.constant 0 : i32
    return %arg0, %c0_i32 : i32, i32
  }
}

module attributes {stable_mosaic.version = 11 : i64} {
  func.func @_downsampler_kernel(%arg0: i32, %arg1: i32, %arg2: memref<16x128xbf16, #tpu.memory_space<vmem>>, %arg3: memref<128x128xbf16, #tpu.memory_space<vmem>>, %arg4: memref<1x128xf32, #tpu.memory_space<vmem>>, %arg5: memref<128x128xbf16, #tpu.memory_space<vmem>>, %arg6: memref<1x128xf32, #tpu.memory_space<vmem>>, %arg7: memref<128x128xbf16, #tpu.memory_space<vmem>>, %arg8: memref<1x128xf32, #tpu.memory_space<vmem>>, %arg9: memref<16x128xf32, #tpu.memory_space<vmem>>, %arg10: memref<16x128xf32, #tpu.memory_space<vmem>>) attributes {dimension_semantics = [#tpu.dimension_semantics<parallel>, #tpu.dimension_semantics<arbitrary>], iteration_bounds = array<i64: 1, 1>, scalar_prefetch = 0 : i64, scratch_operands = 1 : i64, tpu.core_type = #tpu.core_type<tc>, window_params = [{transform_indices = @transform_0, window_bounds = array<i64: 16, 128>}, {transform_indices = @transform_1, window_bounds = array<i64: 128, 128>}, {pipeline_mode = #tpu.pipeline_mode<synchronous>, transform_indices = @transform_2, window_bounds = array<i64: 1, 128>}, {pipeline_mode = #tpu.pipeline_mode<synchronous>, transform_indices = @transform_3, window_bounds = array<i64: 128, 128>}, {pipeline_mode = #tpu.pipeline_mode<synchronous>, transform_indices = @transform_4, window_bounds = array<i64: 1, 128>}, {pipeline_mode = #tpu.pipeline_mode<synchronous>, transform_indices = @transform_5, window_bounds = array<i64: 128, 128>}, {pipeline_mode = #tpu.pipeline_mode<synchronous>, transform_indices = @transform_6, window_bounds = array<i64: 1, 128>}, {transform_indices = @transform_7, window_bounds = array<i64: 16, 128>}]} {
    %c0_i32 = arith.constant 0 : i32
    %0 = arith.cmpi eq, %arg1, %c0_i32 : i32
    %1 = arith.extui %0 : i1 to i32
    %c0_i32_0 = arith.constant 0 : i32
    %2 = arith.cmpi ne, %1, %c0_i32_0 : i32
    scf.if %2 {
      %cst_10 = arith.constant 0.000000e+00 : f32
      %12 = vector.broadcast %cst_10 : f32 to vector<16x128xf32>
      %c0_11 = arith.constant 0 : index
      %c0_12 = arith.constant 0 : index
      %13 = vector.load %arg10[%c0_11, %c0_12] : memref<16x128xf32, #tpu.memory_space<vmem>>, vector<16x128xf32>
      tpu.vector_store %arg10[%c0_11, %c0_12], %12 {strides = array<i32>} : memref<16x128xf32, #tpu.memory_space<vmem>>, vector<16x128xf32>,
    } else {
    }
    %c0 = arith.constant 0 : index
    %c0_1 = arith.constant 0 : index
    %3 = vector.load %arg10[%c0, %c0_1] : memref<16x128xf32, #tpu.memory_space<vmem>>, vector<16x128xf32>
    %c0_2 = arith.constant 0 : index
    %c0_3 = arith.constant 0 : index
    %4 = vector.load %arg2[%c0_2, %c0_3] : memref<16x128xbf16, #tpu.memory_space<vmem>>, vector<16x128xbf16>
    %c0_4 = arith.constant 0 : index
    %c0_5 = arith.constant 0 : index
    %5 = vector.load %arg3[%c0_4, %c0_5] : memref<128x128xbf16, #tpu.memory_space<vmem>>, vector<128x128xbf16>
    %cst = arith.constant dense<0.000000e+00> : vector<16x128xf32>
    %6 = tpu.matmul %4, %5, %cst {dimension_numbers = #tpu.dot_dimension_numbers<[1], [0], [0], [1], [0, 0, 1, 1], [], []>} : vector<16x128xbf16>, vector<128x128xbf16>, vector<16x128xf32> -> vector<16x128xf32>
    %7 = arith.addf %3, %6 : vector<16x128xf32>
    %c0_6 = arith.constant 0 : index
    %c0_7 = arith.constant 0 : index
    %8 = vector.load %arg10[%c0_6, %c0_7] : memref<16x128xf32, #tpu.memory_space<vmem>>, vector<16x128xf32>
    tpu.vector_store %arg10[%c0_6, %c0_7], %7 {strides = array<i32>} : memref<16x128xf32, #tpu.memory_space<vmem>>, vector<16x128xf32>,
    %c0_i32_8 = arith.constant 0 : i32
    %9 = arith.cmpi eq, %arg1, %c0_i32_8 : i32
    %10 = arith.extui %9 : i1 to i32
    %c0_i32_9 = arith.constant 0 : i32
    %11 = arith.cmpi ne, %10, %c0_i32_9 : i32
    scf.if %11 {
      %c0_10 = arith.constant 0 : index
      %c0_11 = arith.constant 0 : index
      %12 = vector.load %arg10[%c0_10, %c0_11] : memref<16x128xf32, #tpu.memory_space<vmem>>, vector<16x128xf32>
      %c0_12 = arith.constant 0 : index
      %c0_13 = arith.constant 0 : index
      %13 = vector.load %arg4[%c0_12, %c0_13] : memref<1x128xf32, #tpu.memory_space<vmem>>, vector<1x128xf32>
      %14 = vector.broadcast %13 : vector<1x128xf32> to vector<16x128xf32>
      %15 = arith.addf %12, %14 : vector<16x128xf32>
      %cst_14 = arith.constant 0.000000e+00 : f32
      %16 = vector.broadcast %cst_14 : f32 to vector<16x128xf32>
      %17 = arith.maximumf %15, %16 : vector<16x128xf32>
      %18 = arith.truncf %17 : vector<16x128xf32> to vector<16x128xbf16>
      %c0_15 = arith.constant 0 : index
      %c0_16 = arith.constant 0 : index
      %19 = vector.load %arg5[%c0_15, %c0_16] : memref<128x128xbf16, #tpu.memory_space<vmem>>, vector<128x128xbf16>
      %cst_17 = arith.constant dense<0.000000e+00> : vector<16x128xf32>
      %20 = tpu.matmul %18, %19, %cst_17 {dimension_numbers = #tpu.dot_dimension_numbers<[1], [0], [0], [1], [0, 0, 1, 1], [], []>} : vector<16x128xbf16>, vector<128x128xbf16>, vector<16x128xf32> -> vector<16x128xf32>
      %c0_18 = arith.constant 0 : index
      %c0_19 = arith.constant 0 : index
      %21 = vector.load %arg6[%c0_18, %c0_19] : memref<1x128xf32, #tpu.memory_space<vmem>>, vector<1x128xf32>
      %22 = vector.broadcast %21 : vector<1x128xf32> to vector<16x128xf32>
      %23 = arith.addf %20, %22 : vector<16x128xf32>
      %cst_20 = arith.constant 0.000000e+00 : f32
      %24 = vector.broadcast %cst_20 : f32 to vector<16x128xf32>
      %25 = arith.maximumf %23, %24 : vector<16x128xf32>
      %26 = arith.truncf %25 : vector<16x128xf32> to vector<16x128xbf16>
      %c0_21 = arith.constant 0 : index
      %c0_22 = arith.constant 0 : index
      %27 = vector.load %arg7[%c0_21, %c0_22] : memref<128x128xbf16, #tpu.memory_space<vmem>>, vector<128x128xbf16>
      %cst_23 = arith.constant dense<0.000000e+00> : vector<16x128xf32>
      %28 = tpu.matmul %26, %27, %cst_23 {dimension_numbers = #tpu.dot_dimension_numbers<[1], [0], [0], [1], [0, 0, 1, 1], [], []>} : vector<16x128xbf16>, vector<128x128xbf16>, vector<16x128xf32> -> vector<16x128xf32>
      %c0_24 = arith.constant 0 : index
      %c0_25 = arith.constant 0 : index
      %29 = vector.load %arg8[%c0_24, %c0_25] : memref<1x128xf32, #tpu.memory_space<vmem>>, vector<1x128xf32>
      %30 = vector.broadcast %29 : vector<1x128xf32> to vector<16x128xf32>
      %31 = arith.addf %28, %30 : vector<16x128xf32>
      %c0_26 = arith.constant 0 : index
      %c0_27 = arith.constant 0 : index
      %32 = vector.load %arg9[%c0_26, %c0_27] : memref<16x128xf32, #tpu.memory_space<vmem>>, vector<16x128xf32>
      tpu.vector_store %arg9[%c0_26, %c0_27], %31 {strides = array<i32>} : memref<16x128xf32, #tpu.memory_space<vmem>>, vector<16x128xf32>,
    } else {
    }
    return
  }
  func.func @transform_0(%arg0: i32, %arg1: i32) -> (i32, i32) {
    %c0_i32 = arith.constant 0 : i32
    return %arg0, %arg1 : i32, i32
  }
  func.func @transform_1(%arg0: i32, %arg1: i32) -> (i32, i32) {
    %c0_i32 = arith.constant 0 : i32
    %c0_i32_0 = arith.constant 0 : i32
    return %arg1, %c0_i32 : i32, i32
  }
  func.func @transform_2(%arg0: i32, %arg1: i32) -> (i32, i32) {
    %c0_i32 = arith.constant 0 : i32
    %c0_i32_0 = arith.constant 0 : i32
    %c0_i32_1 = arith.constant 0 : i32
    return %c0_i32, %c0_i32_0 : i32, i32
  }
  func.func @transform_3(%arg0: i32, %arg1: i32) -> (i32, i32) {
    %c0_i32 = arith.constant 0 : i32
    %c0_i32_0 = arith.constant 0 : i32
    %c0_i32_1 = arith.constant 0 : i32
    return %c0_i32, %c0_i32_0 : i32, i32
  }
  func.func @transform_4(%arg0: i32, %arg1: i32) -> (i32, i32) {
    %c0_i32 = arith.constant 0 : i32
    %c0_i32_0 = arith.constant 0 : i32
    %c0_i32_1 = arith.constant 0 : i32
    return %c0_i32, %c0_i32_0 : i32, i32
  }
  func.func @transform_5(%arg0: i32, %arg1: i32) -> (i32, i32) {
    %c0_i32 = arith.constant 0 : i32
    %c0_i32_0 = arith.constant 0 : i32
    %c0_i32_1 = arith.constant 0 : i32
    return %c0_i32, %c0_i32_0 : i32, i32
  }
  func.func @transform_6(%arg0: i32, %arg1: i32) -> (i32, i32) {
    %c0_i32 = arith.constant 0 : i32
    %c0_i32_0 = arith.constant 0 : i32
    %c0_i32_1 = arith.constant 0 : i32
    return %c0_i32, %c0_i32_0 : i32, i32
  }
  func.func @transform_7(%arg0: i32, %arg1: i32) -> (i32, i32) {
    %c0_i32 = arith.constant 0 : i32
    %c0_i32_0 = arith.constant 0 : i32
    return %arg0, %c0_i32 : i32, i32
  }
}

</mosaic_0001>

<bundles_post_ra>
// kernel: tpu_custom_call.1
= control target key start
LH: loop header
LB: loop body
LE: loop exit
PB: predicated region body
PF: predicated region fallthrough
CT: control target
= control target key end

     0   :  { %12 = vsyncpa [#allocation4], 0  ;;  %s918_s0 = inlined_call_operand.hbm [shape: bf16[16,128], index: 0, kind: input, shape index: {}]   ;;  %s919_s1 = inlined_call_operand.hbm [shape: bf16[128,128], index: 1, kind: input, shape index: {}]   ;;  %s920_s2 = inlined_call_operand.vmem [shape: f32[1,128], index: 2, kind: input, shape index: {}]   ;;  %s921_s3 = inlined_call_operand.hbm [shape: bf16[128,128], index: 3, kind: input, shape index: {}]   ;;  %s922_s4 = inlined_call_operand.vmem [shape: f32[1,128], index: 4, kind: input, shape index: {}]   ;;  %s923_s5 = inlined_call_operand.hbm [shape: bf16[128,128], index: 5, kind: input, shape index: {}]   ;;  %s924_s6 = inlined_call_operand.vmem [shape: f32[1,128], index: 6, kind: input, shape index: {}]   ;;  %s925_s7 = inlined_call_operand.hbm [shape: f32[16,128], index: 7, kind: output, shape index: {}]  }
   0x1   :  { %13 = vsyncpa [#allocation7], 0 }
   0x2   :  { %14 = vsyncpa [#allocation10], 0 }
   0x3   :  { %15 = vsyncpa [#allocation5], 0  ;;  %s742_s24 = smov [#allocation6]   ;;  %s743_s26 = smov [#allocation3]  }
   0x4   :  { %s33_s25 = sshll.u32 %s742_s24, 4  ;;  %s21_s27 = sshll.u32 %s743_s26, 4  ;;  %s34_s25 = int_to_ptr.vmem [resolvable:$true] %s33_s25  ;;  %s793_s27 = int_to_ptr.vmem [resolvable:$true] %s21_s27 }
   0x5   :  { %s624_s30 = scalar_lea.hbm %s919_s1, 1024 }
   0x6   :  { %p625_p0 = scmp.ne.s32.totalorder %s919_s1, %s624_s30  ;;  %p628_p1 = scmp.lt.u32.totalorder %s624_s30, %s919_s1 }
   0x8   :  { %p630_p2 = pnand %p628_p1, %p625_p0 }
   0xa   :  { %633 = shalt.err (!%p630_p2)
}
   0xb   :  { %s634_s12 = scalar_lea.vmem %s34_s25, 1024  ;;  %p639_p4 = scmp.lt.s32.totalorder %s34_s25, %s34_s25 }
   0xc   :  { %p635_p3 = scmp.ne.s32.totalorder %s34_s25, %s634_s12  ;;  %p640_p5 = scmp.lt.s32.totalorder %s634_s12, %s634_s12 }
   0xe   :  { %p641_p6 = por %p640_p5, %p639_p4 }
  0x10   :  { %p642_p7 = pnand %p641_p6, %p635_p3 }
  0x12   :  { %645 = shalt.err (!%p642_p7)
}
  0x13   :  { %s744_s13 = smov 64   ;;  %s745_s14 = smov 4  }
  0x14   :  { %39 = dma.hbm_to_vmem [thread:$0]  %s919_s1, 1024, %s34_s25, [#allocation7], %s744_s13, %s744_s13, %s745_s14  }
  0x15   :  { %s646_s19 = scalar_lea.hbm %s918_s0, 128 }
  0x16   :  { %p647_p8 = scmp.ne.s32.totalorder %s918_s0, %s646_s19  ;;  %p650_p9 = scmp.lt.u32.totalorder %s646_s19, %s918_s0 }
  0x18   :  { %p652_p10 = pnand %p650_p9, %p647_p8 }
  0x1a   :  { %655 = shalt.err (!%p652_p10)
}
  0x1b   :  { %s656_s24 = scalar_lea.vmem %s793_s27, 128  ;;  %p661_p12 = scmp.lt.s32.totalorder %s793_s27, %s793_s27 }
  0x1c   :  { %p657_p11 = scmp.ne.s32.totalorder %s793_s27, %s656_s24  ;;  %p662_p13 = scmp.lt.s32.totalorder %s656_s24, %s656_s24 }
  0x1e   :  { %p663_p0 = por %p662_p13, %p661_p12 }
  0x20   :  { %p664_p1 = pnand %p663_p0, %p657_p11 }
  0x22   :  { %667 = shalt.err (!%p664_p1)
}
  0x23   :  { %27 = dma.hbm_to_vmem [thread:$0]  %s918_s0, 128, %s793_s27, [#allocation4], %s744_s13, %s744_s13, %s745_s14  }
  0x24   :  { %s746_s26 = smov [#allocation8]   ;;  %s747_s29 = smov [#allocation9]  }
  0x25   :  { %s47_s28 = sshll.u32 %s746_s26, 4  ;;  %s61_s30 = sshll.u32 %s747_s29, 4  ;;  %s48_s28 = int_to_ptr.vmem [resolvable:$true] %s47_s28  ;;  %s830_s30 = int_to_ptr.vmem [resolvable:$true] %s61_s30 }
  0x26   :  { %s668_s10 = scalar_lea.hbm %s921_s3, 1024 }
  0x27   :  { %p669_p2 = scmp.ne.s32.totalorder %s921_s3, %s668_s10  ;;  %p672_p3 = scmp.lt.u32.totalorder %s668_s10, %s921_s3 }
  0x29   :  { %p674_p4 = pnand %p672_p3, %p669_p2 }
  0x2b   :  { %677 = shalt.err (!%p674_p4)
}
  0x2c   :  { %s678_s0 = scalar_lea.vmem %s48_s28, 1024  ;;  %p683_p6 = scmp.lt.s32.totalorder %s48_s28, %s48_s28 }
  0x2d   :  { %p679_p5 = scmp.ne.s32.totalorder %s48_s28, %s678_s0  ;;  %p684_p7 = scmp.lt.s32.totalorder %s678_s0, %s678_s0 }
  0x2f   :  { %p685_p8 = por %p684_p7, %p683_p6 }
  0x31   :  { %p686_p9 = pnand %p685_p8, %p679_p5 }
  0x33   :  { %689 = shalt.err (!%p686_p9)
}
  0x34   :  { %53 = dma.hbm_to_vmem [thread:$0]  %s921_s3, 1024, %s48_s28, [#allocation7], %s744_s13, %s744_s13, %s745_s14  }
  0x35   :  { %s690_s20 = scalar_lea.hbm %s923_s5, 1024 }
  0x36   :  { %p691_p10 = scmp.ne.s32.totalorder %s923_s5, %s690_s20  ;;  %p694_p11 = scmp.lt.u32.totalorder %s690_s20, %s923_s5 }
  0x38   :  { %p696_p12 = pnand %p694_p11, %p691_p10 }
  0x3a   :  { %699 = shalt.err (!%p696_p12)
}
  0x3b   :  { %s700_s1 = scalar_lea.vmem %s830_s30, 1024  ;;  %p705_p0 = scmp.lt.s32.totalorder %s830_s30, %s830_s30 }
  0x3c   :  { %p701_p13 = scmp.ne.s32.totalorder %s830_s30, %s700_s1  ;;  %p706_p1 = scmp.lt.s32.totalorder %s700_s1, %s700_s1 }
  0x3e   :  { %p707_p2 = por %p706_p1, %p705_p0 }
  0x40   :  { %p708_p3 = pnand %p707_p2, %p701_p13 }
  0x42   :  { %711 = shalt.err (!%p708_p3)
}
  0x43   :  { %67 = dma.hbm_to_vmem [thread:$0]  %s923_s5, 1024, %s830_s30, [#allocation10], %s744_s13, %s744_s13, %s745_s14  }
  0x44   :  { %734 = dma.done.wait [#allocation4], 128  }
  0x45   :  { %735 = vsyncadd [#allocation4], 4294967168 }
  0x46   :  { %736 = dma.done.wait [#allocation7], 2048  }
  0x47   :  { %737 = vsyncadd [#allocation7], 4294965248 }
  0x48   :  { %738 = dma.done.wait [#allocation10], 1024  }
  0x49   :  { %739 = vsyncadd [#allocation10], 4294966272  ;;  %v748_v0 = vmov 0.0   ;;  %vm749_vm0 = vmmov 0   ;;  %v599_v1 = vld [vmem:[#allocation6] sm:$0xff]   ;;  %v600_v2 = vld [vmem:[#allocation6 + $0x8] sm:$0xff]  }
  0x4a   :  { %528 = vmatprep.subr.bf16.mxu0 %v748_v0  ;;  %544 = vmatprep.mubr.msk.bf16.mxu0 %vm749_vm0, %v748_v0  ;;  %v601_v3 = vld [vmem:[#allocation6 + $0x10] sm:$0xff]   ;;  %v608_v4 = vld [vmem:[#allocation8] sm:$0xff]   ;;  %v602_v5 = vld [vmem:[#allocation6 + $0x18] sm:$0xff]   ;;  %s750_s29 = smov [#allocation11]  }
  0x4b   :  { %548 = vmatprep.subr.bf16.mxu1 %v748_v0  ;;  %564 = vmatprep.mubr.msk.bf16.mxu1 %vm749_vm0, %v748_v0  ;;  %v609_v6 = vld [vmem:[#allocation8 + $0x8] sm:$0xff]   ;;  %v603_v7 = vld [vmem:[#allocation6 + $0x20] sm:$0xff]   ;;  %v610_v8 = vld [vmem:[#allocation8 + $0x10] sm:$0xff]   ;;  %s459_s30 = sshll.u32 %s750_s29, 4  ;;  %s460_s30 = int_to_ptr.vmem [resolvable:$true] %s459_s30 }
  0x4c   :  { %529 = vmatpush3.bf16.msra.mxu0 %v599_v1  ;;  %549 = vmatpush3.bf16.msra.mxu1 %v608_v4  ;;  %v604_v9 = vld [vmem:[#allocation6 + $0x28] sm:$0xff]   ;;  %v611_v10 = vld [vmem:[#allocation8 + $0x18] sm:$0xff]   ;;  %v605_v11 = vld [vmem:[#allocation6 + $0x30] sm:$0xff]   ;;  %p717_p5 = scmp.lt.s32.totalorder %s460_s30, %s460_s30 }
  0x4d   :  { %530 = vmatprep.subr.bf16.mxu0 %v748_v0  ;;  %550 = vmatprep.subr.bf16.mxu1 %v748_v0  ;;  %v612_v12 = vld [vmem:[#allocation8 + $0x20] sm:$0xff]   ;;  %v606_v13 = vld [vmem:[#allocation6 + $0x38] sm:$0xff]   ;;  %v613_v14 = vld [vmem:[#allocation8 + $0x28] sm:$0xff]  }
  0x4e   :  { %v607_v15 = vld [vmem:[#allocation3] sm:$0xff]   ;;  %v614_v16 = vld [vmem:[#allocation8 + $0x30] sm:$0xff]   ;;  %v616_v18 = vld [vmem:[#allocation9] sm:$0xff]  }
  0x4f   :  { %v615_v17 = vld [vmem:[#allocation8 + $0x38] sm:$0xff]   ;;  %v617_v19 = vld [vmem:[#allocation9 + $0x8] sm:$0xff]   ;;  %v618_v20 = vld [vmem:[#allocation9 + $0x10] sm:$0xff]  }
  0x50   :  { %531 = vmatpush3.bf16.msra.mxu0 %v600_v2  ;;  %551 = vmatpush3.bf16.msra.mxu1 %v609_v6  ;;  %v619_v21 = vld [vmem:[#allocation9 + $0x18] sm:$0xff]   ;;  %v620_v22 = vld [vmem:[#allocation9 + $0x20] sm:$0xff]   ;;  %v621_v23 = vld [vmem:[#allocation9 + $0x28] sm:$0xff]  }
  0x51   :  { %532 = vmatprep.subr.bf16.mxu0 %v748_v0  ;;  %552 = vmatprep.subr.bf16.mxu1 %v748_v0  ;;  %v482_v24 = vld [vmem:[%s920_s2] ss:$0 sm:$0xff]  ;;  %v622_v34 = vld [vmem:[#allocation9 + $0x30] sm:$0xff]  }
  0x52   :  { %v623_v35 = vld [vmem:[#allocation9 + $0x38] sm:$0xff]  }
  0x53   :  { %v483_v36 = vld [vmem:[%s922_s4] ss:$0 sm:$0xff]  ;;  %s712_s4 = scalar_lea.vmem %s460_s30, 256 }
  0x54   :  { %533 = vmatpush3.bf16.msra.mxu0 %v601_v3  ;;  %553 = vmatpush3.bf16.msra.mxu1 %v610_v8  ;;  %v492_v46 = vld [vmem:[%s924_s6] ss:$0 sm:$0xff]  ;;  %p713_p4 = scmp.ne.s32.totalorder %s460_s30, %s712_s4  ;;  %p718_p6 = scmp.lt.s32.totalorder %s712_s4, %s712_s4 }
  0x55   :  { %534 = vmatprep.subr.bf16.mxu0 %v748_v0  ;;  %554 = vmatprep.subr.bf16.mxu1 %v748_v0 }
  0x56   :  { %p719_p7 = por %p718_p6, %p717_p5 }
  0x58   :  { %535 = vmatpush3.bf16.msra.mxu0 %v602_v5  ;;  %555 = vmatpush3.bf16.msra.mxu1 %v611_v10  ;;  %p720_p8 = pnand %p719_p7, %p713_p4 }
  0x59   :  { %536 = vmatprep.subr.bf16.mxu0 %v748_v0  ;;  %556 = vmatprep.subr.bf16.mxu1 %v748_v0 }
  0x5c   :  { %537 = vmatpush3.bf16.msra.mxu0 %v603_v7  ;;  %557 = vmatpush3.bf16.msra.mxu1 %v612_v12 }
  0x5d   :  { %538 = vmatprep.subr.bf16.mxu0 %v748_v0  ;;  %558 = vmatprep.subr.bf16.mxu1 %v748_v0 }
  0x60   :  { %539 = vmatpush3.bf16.msra.mxu0 %v604_v9  ;;  %559 = vmatpush3.bf16.msra.mxu1 %v613_v14 }
  0x61   :  { %540 = vmatprep.subr.bf16.mxu0 %v748_v0  ;;  %560 = vmatprep.subr.bf16.mxu1 %v748_v0 }
  0x64   :  { %541 = vmatpush3.bf16.msra.mxu0 %v605_v11  ;;  %561 = vmatpush3.bf16.msra.mxu1 %v614_v16 }
  0x65   :  { %542 = vmatprep.subr.bf16.mxu0 %v748_v0  ;;  %562 = vmatprep.subr.bf16.mxu1 %v748_v0 }
  0x68   :  { %543 = vmatpush3.bf16.msra.mxu0 %v606_v13  ;;  %563 = vmatpush3.bf16.msra.mxu1 %v615_v17 }
  0x69   :  { %568 = vmatprep.subr.bf16.mxu0 %v748_v0 }
  0x6b   :  { %545 = vmatmul.mubr.bf16.vlgmr.msra.gmra.mrb[0].mxu0 %v607_v15 }
  0x6c   :  { %584 = vmatprep.mubr.msk.bf16.mxu0 %vm749_vm0, %v748_v0  ;;  %569 = vmatpush3.bf16.msra.mxu0 %v616_v18 }
  0x6d   :  { %570 = vmatprep.subr.bf16.mxu0 %v748_v0 }
  0x70   :  { %571 = vmatpush3.bf16.msra.mxu0 %v617_v19 }
  0x71   :  { %572 = vmatprep.subr.bf16.mxu0 %v748_v0 }
  0x74   :  { %573 = vmatpush3.bf16.msra.mxu0 %v618_v20 }
  0x75   :  { %574 = vmatprep.subr.bf16.mxu0 %v748_v0 }
  0x78   :  { %575 = vmatpush3.bf16.msra.mxu0 %v619_v21 }
  0x79   :  { %576 = vmatprep.subr.bf16.mxu0 %v748_v0 }
  0x7c   :  { %577 = vmatpush3.bf16.msra.mxu0 %v620_v22 }
  0x7d   :  { %578 = vmatprep.subr.bf16.mxu0 %v748_v0 }
  0x80   :  { %579 = vmatpush3.bf16.msra.mxu0 %v621_v23 }
  0x81   :  { %580 = vmatprep.subr.bf16.mxu0 %v748_v0 }
  0x84   :  { %581 = vmatpush3.bf16.msra.mxu0 %v622_v34 }
  0x85   :  { %582 = vmatprep.subr.bf16.mxu0 %v748_v0 }
  0x88   :  { %583 = vmatpush3.bf16.msra.mxu0 %v623_v35 }
 0x13e   :  { %v197_v25 = vpop.f32.mrb[0].mxu0 }
 0x13f   :  { %v220_v26 = vadd.f32 %v482_v24, %v197_v25  ;;  %v546_v27 = vpop.f32.mrb[1].mxu0 }
 0x140   :  { %v200_v28 = vpop.f32.mrb[2].mxu0 }
 0x141   :  { %v221_v29 = vadd.f32 %v482_v24, %v200_v28  ;;  %v547_v30 = vpop.f32.mrb[3].mxu0  ;;  %v222_v31 = vmax.f32 %v220_v26, 0.0 }
 0x143   :  { %v223_v32 = vmax.f32 %v221_v29, 0.0 }
 0x145   :  { %v224_v33 = vpack.c.bf16 %v223_v32, %v222_v31 }
 0x147   :  { %565 = vmatmul.mubr.bf16.vlgmr.msra.gmra.mrb[0].mxu1 %v224_v33 }
 0x21a   :  { %v330_v37 = vpop.f32.mrb[0].mxu1 }
 0x21b   :  { %v331_v38 = vadd.f32 %v483_v36, %v330_v37  ;;  %v566_v39 = vpop.f32.mrb[1].mxu1 }
 0x21c   :  { %v333_v40 = vpop.f32.mrb[2].mxu1 }
 0x21d   :  { %v334_v41 = vadd.f32 %v483_v36, %v333_v40  ;;  %v567_v42 = vpop.f32.mrb[3].mxu1  ;;  %v337_v43 = vmax.f32 %v331_v38, 0.0 }
 0x21f   :  { %v338_v44 = vmax.f32 %v334_v41, 0.0 }
 0x221   :  { %v339_v45 = vpack.c.bf16 %v338_v44, %v337_v43 }
 0x223   :  { %585 = vmatmul.mubr.bf16.vlgmr.msra.gmra.mrb[4].mxu0 %v339_v45 }
 0x2f6   :  { %v445_v47 = vpop.f32.mrb[4].mxu0 }
 0x2f7   :  { %v446_v48 = vadd.f32 %v492_v46, %v445_v47  ;;  %v586_v49 = vpop.f32.mrb[5].mxu0 }
 0x2f8   :  { %v448_v50 = vpop.f32.mrb[6].mxu0 }
 0x2f9   :  { %452 = vst [vmem:[#allocation11] sm:$0xff] %v446_v48  ;;  %v449_v51 = vadd.f32 %v492_v46, %v448_v50  ;;  %v587_v52 = vpop.f32.mrb[7].mxu0 }
 0x2fb   :  { %453 = vst [vmem:[#allocation11 + $0x8] sm:$0xff] %v449_v51 }
 0x2fc   :  { %723 = shalt.err (!%p720_p8)
}
 0x2fd   :  { %s724_s9 = scalar_lea.hbm %s925_s7, 256 }
 0x2fe   :  { %p725_p9 = scmp.ne.s32.totalorder %s925_s7, %s724_s9  ;;  %p728_p10 = scmp.lt.u32.totalorder %s724_s9, %s925_s7 }
 0x300   :  { %p730_p11 = pnand %p728_p10, %p725_p9 }
 0x302   :  { %733 = shalt.err (!%p730_p11)
}
 0x303   :  { %s751_s16 = smov 128   ;;  %s752_s0 = smov 8  }
 0x304   :  { %465 = dma.vmem_to_hbm [thread:$0]  %s460_s30, 256, %s925_s7, [#allocation5], %s751_s16, %s751_s16, %s752_s0  }
 0x305   :  { %740 = dma.done.wait [#allocation5], 256  }
 0x306   :  { %741 = vsyncadd [#allocation5], 4294967040 }
 0x307   :  { %469 = vsyncpa [#allocation4], 1 }
 0x308   :  { %470 = vsyncpa [#allocation7], 1 }
 0x309   :  { %471 = vsyncpa [#allocation10], 1 }
 0x30a   :  { %472 = vsyncpa [#allocation5], 1 }

// kernel: tpu_custom_call.1
= control target key start
LH: loop header
LB: loop body
LE: loop exit
PB: predicated region body
PF: predicated region fallthrough
CT: control target
= control target key end

     0   :  { %12 = vsyncpa [#allocation4], 0  ;;  %s918_s0 = inlined_call_operand.hbm [shape: bf16[16,128], index: 0, kind: input, shape index: {}]   ;;  %s919_s1 = inlined_call_operand.hbm [shape: bf16[128,128], index: 1, kind: input, shape index: {}]   ;;  %s920_s2 = inlined_call_operand.vmem [shape: f32[1,128], index: 2, kind: input, shape index: {}]   ;;  %s921_s3 = inlined_call_operand.hbm [shape: bf16[128,128], index: 3, kind: input, shape index: {}]   ;;  %s922_s4 = inlined_call_operand.vmem [shape: f32[1,128], index: 4, kind: input, shape index: {}]   ;;  %s923_s5 = inlined_call_operand.hbm [shape: bf16[128,128], index: 5, kind: input, shape index: {}]   ;;  %s924_s6 = inlined_call_operand.vmem [shape: f32[1,128], index: 6, kind: input, shape index: {}]   ;;  %s925_s7 = inlined_call_operand.hbm [shape: f32[16,128], index: 7, kind: output, shape index: {}]  }
   0x1   :  { %13 = vsyncpa [#allocation7], 0 }
   0x2   :  { %14 = vsyncpa [#allocation10], 0 }
   0x3   :  { %15 = vsyncpa [#allocation5], 0  ;;  %s742_s24 = smov [#allocation6]   ;;  %s743_s26 = smov [#allocation3]  }
   0x4   :  { %s33_s25 = sshll.u32 %s742_s24, 4  ;;  %s21_s27 = sshll.u32 %s743_s26, 4  ;;  %s34_s25 = int_to_ptr.vmem [resolvable:$true] %s33_s25  ;;  %s793_s27 = int_to_ptr.vmem [resolvable:$true] %s21_s27 }
   0x5   :  { %s624_s30 = scalar_lea.hbm %s919_s1, 1024 }
   0x6   :  { %p625_p0 = scmp.ne.s32.totalorder %s919_s1, %s624_s30  ;;  %p628_p1 = scmp.lt.u32.totalorder %s624_s30, %s919_s1 }
   0x8   :  { %p630_p2 = pnand %p628_p1, %p625_p0 }
   0xa   :  { %633 = shalt.err (!%p630_p2)
}
   0xb   :  { %s634_s12 = scalar_lea.vmem %s34_s25, 1024  ;;  %p639_p4 = scmp.lt.s32.totalorder %s34_s25, %s34_s25 }
   0xc   :  { %p635_p3 = scmp.ne.s32.totalorder %s34_s25, %s634_s12  ;;  %p640_p5 = scmp.lt.s32.totalorder %s634_s12, %s634_s12 }
   0xe   :  { %p641_p6 = por %p640_p5, %p639_p4 }
  0x10   :  { %p642_p7 = pnand %p641_p6, %p635_p3 }
  0x12   :  { %645 = shalt.err (!%p642_p7)
}
  0x13   :  { %s744_s13 = smov 64   ;;  %s745_s14 = smov 4  }
  0x14   :  { %39 = dma.hbm_to_vmem [thread:$0]  %s919_s1, 1024, %s34_s25, [#allocation7], %s744_s13, %s744_s13, %s745_s14  }
  0x15   :  { %s646_s19 = scalar_lea.hbm %s918_s0, 128 }
  0x16   :  { %p647_p8 = scmp.ne.s32.totalorder %s918_s0, %s646_s19  ;;  %p650_p9 = scmp.lt.u32.totalorder %s646_s19, %s918_s0 }
  0x18   :  { %p652_p10 = pnand %p650_p9, %p647_p8 }
  0x1a   :  { %655 = shalt.err (!%p652_p10)
}
  0x1b   :  { %s656_s24 = scalar_lea.vmem %s793_s27, 128  ;;  %p661_p12 = scmp.lt.s32.totalorder %s793_s27, %s793_s27 }
  0x1c   :  { %p657_p11 = scmp.ne.s32.totalorder %s793_s27, %s656_s24  ;;  %p662_p13 = scmp.lt.s32.totalorder %s656_s24, %s656_s24 }
  0x1e   :  { %p663_p0 = por %p662_p13, %p661_p12 }
  0x20   :  { %p664_p1 = pnand %p663_p0, %p657_p11 }
  0x22   :  { %667 = shalt.err (!%p664_p1)
}
  0x23   :  { %27 = dma.hbm_to_vmem [thread:$0]  %s918_s0, 128, %s793_s27, [#allocation4], %s744_s13, %s744_s13, %s745_s14  }
  0x24   :  { %s746_s26 = smov [#allocation8]   ;;  %s747_s29 = smov [#allocation9]  }
  0x25   :  { %s47_s28 = sshll.u32 %s746_s26, 4  ;;  %s61_s30 = sshll.u32 %s747_s29, 4  ;;  %s48_s28 = int_to_ptr.vmem [resolvable:$true] %s47_s28  ;;  %s830_s30 = int_to_ptr.vmem [resolvable:$true] %s61_s30 }
  0x26   :  { %s668_s10 = scalar_lea.hbm %s921_s3, 1024 }
  0x27   :  { %p669_p2 = scmp.ne.s32.totalorder %s921_s3, %s668_s10  ;;  %p672_p3 = scmp.lt.u32.totalorder %s668_s10, %s921_s3 }
  0x29   :  { %p674_p4 = pnand %p672_p3, %p669_p2 }
  0x2b   :  { %677 = shalt.err (!%p674_p4)
}
  0x2c   :  { %s678_s0 = scalar_lea.vmem %s48_s28, 1024  ;;  %p683_p6 = scmp.lt.s32.totalorder %s48_s28, %s48_s28 }
  0x2d   :  { %p679_p5 = scmp.ne.s32.totalorder %s48_s28, %s678_s0  ;;  %p684_p7 = scmp.lt.s32.totalorder %s678_s0, %s678_s0 }
  0x2f   :  { %p685_p8 = por %p684_p7, %p683_p6 }
  0x31   :  { %p686_p9 = pnand %p685_p8, %p679_p5 }
  0x33   :  { %689 = shalt.err (!%p686_p9)
}
  0x34   :  { %53 = dma.hbm_to_vmem [thread:$0]  %s921_s3, 1024, %s48_s28, [#allocation7], %s744_s13, %s744_s13, %s745_s14  }
  0x35   :  { %s690_s20 = scalar_lea.hbm %s923_s5, 1024 }
  0x36   :  { %p691_p10 = scmp.ne.s32.totalorder %s923_s5, %s690_s20  ;;  %p694_p11 = scmp.lt.u32.totalorder %s690_s20, %s923_s5 }
  0x38   :  { %p696_p12 = pnand %p694_p11, %p691_p10 }
  0x3a   :  { %699 = shalt.err (!%p696_p12)
}
  0x3b   :  { %s700_s1 = scalar_lea.vmem %s830_s30, 1024  ;;  %p705_p0 = scmp.lt.s32.totalorder %s830_s30, %s830_s30 }
  0x3c   :  { %p701_p13 = scmp.ne.s32.totalorder %s830_s30, %s700_s1  ;;  %p706_p1 = scmp.lt.s32.totalorder %s700_s1, %s700_s1 }
  0x3e   :  { %p707_p2 = por %p706_p1, %p705_p0 }
  0x40   :  { %p708_p3 = pnand %p707_p2, %p701_p13 }
  0x42   :  { %711 = shalt.err (!%p708_p3)
}
  0x43   :  { %67 = dma.hbm_to_vmem [thread:$0]  %s923_s5, 1024, %s830_s30, [#allocation10], %s744_s13, %s744_s13, %s745_s14  }
  0x44   :  { %734 = dma.done.wait [#allocation4], 128  }
  0x45   :  { %735 = vsyncadd [#allocation4], 4294967168 }
  0x46   :  { %736 = dma.done.wait [#allocation7], 2048  }
  0x47   :  { %737 = vsyncadd [#allocation7], 4294965248 }
  0x48   :  { %738 = dma.done.wait [#allocation10], 1024  }
  0x49   :  { %739 = vsyncadd [#allocation10], 4294966272  ;;  %v748_v0 = vmov 0.0   ;;  %vm749_vm0 = vmmov 0   ;;  %v599_v1 = vld [vmem:[#allocation6] sm:$0xff]   ;;  %v600_v2 = vld [vmem:[#allocation6 + $0x8] sm:$0xff]  }
  0x4a   :  { %528 = vmatprep.subr.bf16.mxu0 %v748_v0  ;;  %544 = vmatprep.mubr.msk.bf16.mxu0 %vm749_vm0, %v748_v0  ;;  %v601_v3 = vld [vmem:[#allocation6 + $0x10] sm:$0xff]   ;;  %v608_v4 = vld [vmem:[#allocation8] sm:$0xff]   ;;  %v602_v5 = vld [vmem:[#allocation6 + $0x18] sm:$0xff]   ;;  %s750_s29 = smov [#allocation11]  }
  0x4b   :  { %548 = vmatprep.subr.bf16.mxu1 %v748_v0  ;;  %564 = vmatprep.mubr.msk.bf16.mxu1 %vm749_vm0, %v748_v0  ;;  %v609_v6 = vld [vmem:[#allocation8 + $0x8] sm:$0xff]   ;;  %v603_v7 = vld [vmem:[#allocation6 + $0x20] sm:$0xff]   ;;  %v610_v8 = vld [vmem:[#allocation8 + $0x10] sm:$0xff]   ;;  %s459_s30 = sshll.u32 %s750_s29, 4  ;;  %s460_s30 = int_to_ptr.vmem [resolvable:$true] %s459_s30 }
  0x4c   :  { %529 = vmatpush3.bf16.msra.mxu0 %v599_v1  ;;  %549 = vmatpush3.bf16.msra.mxu1 %v608_v4  ;;  %v604_v9 = vld [vmem:[#allocation6 + $0x28] sm:$0xff]   ;;  %v611_v10 = vld [vmem:[#allocation8 + $0x18] sm:$0xff]   ;;  %v605_v11 = vld [vmem:[#allocation6 + $0x30] sm:$0xff]   ;;  %p717_p5 = scmp.lt.s32.totalorder %s460_s30, %s460_s30 }
  0x4d   :  { %530 = vmatprep.subr.bf16.mxu0 %v748_v0  ;;  %550 = vmatprep.subr.bf16.mxu1 %v748_v0  ;;  %v612_v12 = vld [vmem:[#allocation8 + $0x20] sm:$0xff]   ;;  %v606_v13 = vld [vmem:[#allocation6 + $0x38] sm:$0xff]   ;;  %v613_v14 = vld [vmem:[#allocation8 + $0x28] sm:$0xff]  }
  0x4e   :  { %v607_v15 = vld [vmem:[#allocation3] sm:$0xff]   ;;  %v614_v16 = vld [vmem:[#allocation8 + $0x30] sm:$0xff]   ;;  %v616_v18 = vld [vmem:[#allocation9] sm:$0xff]  }
  0x4f   :  { %v615_v17 = vld [vmem:[#allocation8 + $0x38] sm:$0xff]   ;;  %v617_v19 = vld [vmem:[#allocation9 + $0x8] sm:$0xff]   ;;  %v618_v20 = vld [vmem:[#allocation9 + $0x10] sm:$0xff]  }
  0x50   :  { %531 = vmatpush3.bf16.msra.mxu0 %v600_v2  ;;  %551 = vmatpush3.bf16.msra.mxu1 %v609_v6  ;;  %v619_v21 = vld [vmem:[#allocation9 + $0x18] sm:$0xff]   ;;  %v620_v22 = vld [vmem:[#allocation9 + $0x20] sm:$0xff]   ;;  %v621_v23 = vld [vmem:[#allocation9 + $0x28] sm:$0xff]  }
  0x51   :  { %532 = vmatprep.subr.bf16.mxu0 %v748_v0  ;;  %552 = vmatprep.subr.bf16.mxu1 %v748_v0  ;;  %v482_v24 = vld [vmem:[%s920_s2] ss:$0 sm:$0xff]  ;;  %v622_v34 = vld [vmem:[#allocation9 + $0x30] sm:$0xff]  }
  0x52   :  { %v623_v35 = vld [vmem:[#allocation9 + $0x38] sm:$0xff]  }
  0x53   :  { %v483_v36 = vld [vmem:[%s922_s4] ss:$0 sm:$0xff]  ;;  %s712_s4 = scalar_lea.vmem %s460_s30, 256 }
  0x54   :  { %533 = vmatpush3.bf16.msra.mxu0 %v601_v3  ;;  %553 = vmatpush3.bf16.msra.mxu1 %v610_v8  ;;  %v492_v46 = vld [vmem:[%s924_s6] ss:$0 sm:$0xff]  ;;  %p713_p4 = scmp.ne.s32.totalorder %s460_s30, %s712_s4  ;;  %p718_p6 = scmp.lt.s32.totalorder %s712_s4, %s712_s4 }
  0x55   :  { %534 = vmatprep.subr.bf16.mxu0 %v748_v0  ;;  %554 = vmatprep.subr.bf16.mxu1 %v748_v0 }
  0x56   :  { %p719_p7 = por %p718_p6, %p717_p5 }
  0x58   :  { %535 = vmatpush3.bf16.msra.mxu0 %v602_v5  ;;  %555 = vmatpush3.bf16.msra.mxu1 %v611_v10  ;;  %p720_p8 = pnand %p719_p7, %p713_p4 }
  0x59   :  { %536 = vmatprep.subr.bf16.mxu0 %v748_v0  ;;  %556 = vmatprep.subr.bf16.mxu1 %v748_v0 }
  0x5c   :  { %537 = vmatpush3.bf16.msra.mxu0 %v603_v7  ;;  %557 = vmatpush3.bf16.msra.mxu1 %v612_v12 }
  0x5d   :  { %538 = vmatprep.subr.bf16.mxu0 %v748_v0  ;;  %558 = vmatprep.subr.bf16.mxu1 %v748_v0 }
  0x60   :  { %539 = vmatpush3.bf16.msra.mxu0 %v604_v9  ;;  %559 = vmatpush3.bf16.msra.mxu1 %v613_v14 }
  0x61   :  { %540 = vmatprep.subr.bf16.mxu0 %v748_v0  ;;  %560 = vmatprep.subr.bf16.mxu1 %v748_v0 }
  0x64   :  { %541 = vmatpush3.bf16.msra.mxu0 %v605_v11  ;;  %561 = vmatpush3.bf16.msra.mxu1 %v614_v16 }
  0x65   :  { %542 = vmatprep.subr.bf16.mxu0 %v748_v0  ;;  %562 = vmatprep.subr.bf16.mxu1 %v748_v0 }
  0x68   :  { %543 = vmatpush3.bf16.msra.mxu0 %v606_v13  ;;  %563 = vmatpush3.bf16.msra.mxu1 %v615_v17 }
  0x69   :  { %568 = vmatprep.subr.bf16.mxu0 %v748_v0 }
  0x6b   :  { %545 = vmatmul.mubr.bf16.vlgmr.msra.gmra.mrb[0].mxu0 %v607_v15 }
  0x6c   :  { %584 = vmatprep.mubr.msk.bf16.mxu0 %vm749_vm0, %v748_v0  ;;  %569 = vmatpush3.bf16.msra.mxu0 %v616_v18 }
  0x6d   :  { %570 = vmatprep.subr.bf16.mxu0 %v748_v0 }
  0x70   :  { %571 = vmatpush3.bf16.msra.mxu0 %v617_v19 }
  0x71   :  { %572 = vmatprep.subr.bf16.mxu0 %v748_v0 }
  0x74   :  { %573 = vmatpush3.bf16.msra.mxu0 %v618_v20 }
  0x75   :  { %574 = vmatprep.subr.bf16.mxu0 %v748_v0 }
  0x78   :  { %575 = vmatpush3.bf16.msra.mxu0 %v619_v21 }
  0x79   :  { %576 = vmatprep.subr.bf16.mxu0 %v748_v0 }
  0x7c   :  { %577 = vmatpush3.bf16.msra.mxu0 %v620_v22 }
  0x7d   :  { %578 = vmatprep.subr.bf16.mxu0 %v748_v0 }
  0x80   :  { %579 = vmatpush3.bf16.msra.mxu0 %v621_v23 }
  0x81   :  { %580 = vmatprep.subr.bf16.mxu0 %v748_v0 }
  0x84   :  { %581 = vmatpush3.bf16.msra.mxu0 %v622_v34 }
  0x85   :  { %582 = vmatprep.subr.bf16.mxu0 %v748_v0 }
  0x88   :  { %583 = vmatpush3.bf16.msra.mxu0 %v623_v35 }
 0x13e   :  { %v197_v25 = vpop.f32.mrb[0].mxu0 }
 0x13f   :  { %v220_v26 = vadd.f32 %v482_v24, %v197_v25  ;;  %v546_v27 = vpop.f32.mrb[1].mxu0 }
 0x140   :  { %v200_v28 = vpop.f32.mrb[2].mxu0 }
 0x141   :  { %v221_v29 = vadd.f32 %v482_v24, %v200_v28  ;;  %v547_v30 = vpop.f32.mrb[3].mxu0  ;;  %v222_v31 = vmax.f32 %v220_v26, 0.0 }
 0x143   :  { %v223_v32 = vmax.f32 %v221_v29, 0.0 }
 0x145   :  { %v224_v33 = vpack.c.bf16 %v223_v32, %v222_v31 }
 0x147   :  { %565 = vmatmul.mubr.bf16.vlgmr.msra.gmra.mrb[0].mxu1 %v224_v33 }
 0x21a   :  { %v330_v37 = vpop.f32.mrb[0].mxu1 }
 0x21b   :  { %v331_v38 = vadd.f32 %v483_v36, %v330_v37  ;;  %v566_v39 = vpop.f32.mrb[1].mxu1 }
 0x21c   :  { %v333_v40 = vpop.f32.mrb[2].mxu1 }
 0x21d   :  { %v334_v41 = vadd.f32 %v483_v36, %v333_v40  ;;  %v567_v42 = vpop.f32.mrb[3].mxu1  ;;  %v337_v43 = vmax.f32 %v331_v38, 0.0 }
 0x21f   :  { %v338_v44 = vmax.f32 %v334_v41, 0.0 }
 0x221   :  { %v339_v45 = vpack.c.bf16 %v338_v44, %v337_v43 }
 0x223   :  { %585 = vmatmul.mubr.bf16.vlgmr.msra.gmra.mrb[4].mxu0 %v339_v45 }
 0x2f6   :  { %v445_v47 = vpop.f32.mrb[4].mxu0 }
 0x2f7   :  { %v446_v48 = vadd.f32 %v492_v46, %v445_v47  ;;  %v586_v49 = vpop.f32.mrb[5].mxu0 }
 0x2f8   :  { %v448_v50 = vpop.f32.mrb[6].mxu0 }
 0x2f9   :  { %452 = vst [vmem:[#allocation11] sm:$0xff] %v446_v48  ;;  %v449_v51 = vadd.f32 %v492_v46, %v448_v50  ;;  %v587_v52 = vpop.f32.mrb[7].mxu0 }
 0x2fb   :  { %453 = vst [vmem:[#allocation11 + $0x8] sm:$0xff] %v449_v51 }
 0x2fc   :  { %723 = shalt.err (!%p720_p8)
}
 0x2fd   :  { %s724_s9 = scalar_lea.hbm %s925_s7, 256 }
 0x2fe   :  { %p725_p9 = scmp.ne.s32.totalorder %s925_s7, %s724_s9  ;;  %p728_p10 = scmp.lt.u32.totalorder %s724_s9, %s925_s7 }
 0x300   :  { %p730_p11 = pnand %p728_p10, %p725_p9 }
 0x302   :  { %733 = shalt.err (!%p730_p11)
}
 0x303   :  { %s751_s16 = smov 128   ;;  %s752_s0 = smov 8  }
 0x304   :  { %465 = dma.vmem_to_hbm [thread:$0]  %s460_s30, 256, %s925_s7, [#allocation5], %s751_s16, %s751_s16, %s752_s0  }
 0x305   :  { %740 = dma.done.wait [#allocation5], 256  }
 0x306   :  { %741 = vsyncadd [#allocation5], 4294967040 }
 0x307   :  { %469 = vsyncpa [#allocation4], 1 }
 0x308   :  { %470 = vsyncpa [#allocation7], 1 }
 0x309   :  { %471 = vsyncpa [#allocation10], 1 }
 0x30a   :  { %472 = vsyncpa [#allocation5], 1 }

</bundles_post_ra>
